<compile_context>
chip_gen: v7x
topology: tpu7x:2x2x1
jax: 0.10.0
libtpu: 0.0.40
codegen_flags: <defaults>
</compile_context>

<pallas_src>
import math
import functools

import jax
import jax.numpy as jnp
from jax import lax
from jax.experimental import pallas as pl
from jax.experimental.pallas import tpu as pltpu


# ---------------------------------------------------------------------------
# Fused MHA Pallas kernel (one grid step == one (batch, Sx-tile) pair)
# ---------------------------------------------------------------------------

def _make_mha_kernel(head_num, k_dim, dv, has_mask):
    hk = head_num * k_dim

    def kernel(*refs):
        if has_mask:
            x_ref, y_ref, wq_ref, bq_ref, wkv_ref, bkv_ref, m_ref, o_ref = refs
        else:
            x_ref, y_ref, wq_ref, bq_ref, wkv_ref, bkv_ref, o_ref = refs

        x = x_ref[0]                     # (tile_sx, d_model)  bf16
        y = y_ref[0]                     # (Sy, d_model)       bf16

        # Fused projections: one GEMM for q (scale pre-folded), one for [k | v].
        # bf16 operands, f32 accumulation; biases added in f32.
        q = jnp.dot(x, wq_ref[...], preferred_element_type=jnp.float32) + bq_ref[...]
        kv = jnp.dot(y, wkv_ref[...], preferred_element_type=jnp.float32) + bkv_ref[...]
        k = kv[:, :hk]                   # (Sy, head_num * k_dim)
        v = kv[:, hk:]                   # (Sy, head_num * dv)

        if has_mask:
            # Compact mask (1 or tile_sx, Sy); broadcasts over query rows and
            # is shared across heads — never materialized at (H, Sx, Sy).
            masked = m_ref[0] != 0.0

        for h in range(head_num):        # static unroll over heads (all on-chip)
            qh = q[:, h * k_dim:(h + 1) * k_dim].astype(jnp.bfloat16)   # (tile_sx, k_dim)
            kh = k[:, h * k_dim:(h + 1) * k_dim].astype(jnp.bfloat16)   # (Sy, k_dim)
            vh = v[:, h * dv:(h + 1) * dv].astype(jnp.bfloat16)         # (Sy, dv)

            # Scores already scaled by 1/sqrt(k_dim) via the folded weights.
            s = lax.dot_general(qh, kh, (((1,), (1,)), ((), ())),
                                preferred_element_type=jnp.float32)
            if has_mask:
                # Reference semantics: masked_fill(mask, 1e-10) (not -inf).
                s = jnp.where(masked, jnp.float32(1e-10), s)

            # Softmax in f32; normalization on the EUP slot.
            s = s - jnp.max(s, axis=-1, keepdims=True)
            p = jnp.exp(s)
            p = p * pl.reciprocal(jnp.sum(p, axis=-1, keepdims=True), approx=True)

            # Write this head's result straight into the output block's lane
            # slice; HBM writeback is one lane-dense (tile_sx, d_model) slab.
            o_ref[0, :, h * dv:(h + 1) * dv] = jnp.dot(
                p.astype(jnp.bfloat16), vh, preferred_element_type=jnp.float32)

    return kernel


# ---------------------------------------------------------------------------
# Parameter folding (done once, outside the forward)
# ---------------------------------------------------------------------------

def fuse_mha_params(raw, k_dim):
    """Fold chained Linear pairs, fold the 1/sqrt(k_dim) scale into the q path,
    concatenate k/v weights, and store GEMM weights pre-transposed in bf16.

    `raw` holds PyTorch-convention params: W is (d_out, d_in), b is (d_out,).
    """
    hp = lax.Precision.HIGHEST
    scale = 1.0 / math.sqrt(k_dim)

    def eff(base, multi, s=1.0):
        w = jnp.matmul(multi["W"], base["W"], precision=hp).T          # (d_in, d_out)
        b = jnp.matmul(base["b"], multi["W"].T, precision=hp) + multi["b"]
        return w * s, b * s

    wq, bq = eff(raw["q_linear"], raw["q_multi_linear"], scale)
    wk, bk = eff(raw["k_linear"], raw["k_multi_linear"])
    wv, bv = eff(raw["v_linear"], raw["v_multi_linear"])
    return {
        "Wq": wq.astype(jnp.bfloat16),                                  # (d_model, hk)
        "bq": bq.reshape(1, -1).astype(jnp.float32),
        "Wkv": jnp.concatenate([wk, wv], axis=1).astype(jnp.bfloat16),  # (d_model, hk+d_model)
        "bkv": jnp.concatenate([bk, bv]).reshape(1, -1).astype(jnp.float32),
    }


def _prepare_mask(mask, batch, sx, sy):
    """Compact (B, 1 or Sx, Sy) f32 mask (torch right-aligned broadcasting);
    head (and, when possible, query-row) broadcasting happens in-kernel."""
    if mask is None:
        return None
    m = jnp.asarray(mask)
    m4 = m.reshape((1,) * (4 - m.ndim) + m.shape)      # align against (B, H, Sx, Sy)
    if m4.shape[1] != 1:
        # TODO(synk): per-head masks would need a (B, H, Sx, Sy) kernel input.
        raise NotImplementedError("per-head attention masks are not supported")
    m3 = m4[:, 0]                                      # (b?, sx?, Sy?)
    sx_m = 1 if m3.shape[1] == 1 else sx
    return jnp.broadcast_to(m3, (batch, sx_m, sy)).astype(jnp.float32)


def _pick_sx_tile(sx, target=256):
    """Largest multiple-of-8 divisor of Sx that is <= target (VMEM sizing for
    the 64 MiB v7x generation); falls back to the full Sx."""
    if sx <= target:
        return sx
    for t in range(target, 7, -8):
        if sx % t == 0:
            return t
    return sx


# ---------------------------------------------------------------------------
# Public forward (equivalent of Multi_Head_Attention.forward; dropout = id)
# ---------------------------------------------------------------------------

def multi_head_attention(fused, x, y, mask=None, *, head_num, k_dim):
    batch, sx, d_model = x.shape
    sy = y.shape[1]
    assert d_model % head_num == 0
    dv = d_model // head_num
    hk = head_num * k_dim

    tile_sx = _pick_sx_tile(sx)
    n_sx = sx // tile_sx

    # bf16 activations: native MXU input dtype and half the activation DMA bytes.
    x_bf = x.astype(jnp.bfloat16)
    y_bf = y.astype(jnp.bfloat16)

    m3 = _prepare_mask(mask, batch, sx, sy)
    has_mask = m3 is not None

    kernel = _make_mha_kernel(head_num, k_dim, dv, has_mask)

    in_specs = [
        pl.BlockSpec((1, tile_sx, d_model), lambda b, i: (b, i, 0)),       # x
        pl.BlockSpec((1, sy, d_model), lambda b, i: (b, 0, 0)),            # y
        pl.BlockSpec((d_model, hk), lambda b, i: (0, 0)),                  # Wq_eff (bf16)
        pl.BlockSpec((1, hk), lambda b, i: (0, 0)),                        # bq_eff (f32)
        pl.BlockSpec((d_model, hk + d_model), lambda b, i: (0, 0)),        # Wkv_eff (bf16)
        pl.BlockSpec((1, hk + d_model), lambda b, i: (0, 0)),              # bkv_eff (f32)
    ]
    args = [x_bf, y_bf, fused["Wq"], fused["bq"], fused["Wkv"], fused["bkv"]]
    if has_mask:
        if m3.shape[1] == 1:
            in_specs.append(pl.BlockSpec((1, 1, sy), lambda b, i: (b, 0, 0)))
        else:
            in_specs.append(pl.BlockSpec((1, tile_sx, sy), lambda b, i: (b, i, 0)))
        args.append(m3)

    # Advisory cost estimate so XLA schedules neighbors around the custom call.
    flops = 2 * batch * (sx * d_model * hk                    # q projection
                         + sy * d_model * (hk + d_model)      # k|v projection
                         + head_num * sx * sy * (k_dim + dv)) # scores + PV
    bytes_accessed = (x_bf.size * 2 + y_bf.size * 2
                      + fused["Wq"].size * 2 + fused["Wkv"].size * 2
                      + fused["bq"].size * 4 + fused["bkv"].size * 4
                      + (m3.size * 4 if has_mask else 0)
                      + batch * sx * d_model * 4)
    cost = pl.CostEstimate(flops=flops,
                           transcendentals=batch * head_num * sx * sy,
                           bytes_accessed=bytes_accessed)

    return pl.pallas_call(
        kernel,
        out_shape=jax.ShapeDtypeStruct((batch, sx, d_model), jnp.float32),
        grid=(batch, n_sx),
        in_specs=in_specs,
        out_specs=pl.BlockSpec((1, tile_sx, d_model), lambda b, i: (b, i, 0)),
        compiler_params=pltpu.CompilerParams(
            dimension_semantics=("parallel", "parallel")),
        cost_estimate=cost,
    )(*args)


# ---------------------------------------------------------------------------
# Deterministic init (PyTorch nn.Linear convention) + pure-JAX reference
# ---------------------------------------------------------------------------

def init_linear(key, d_in, d_out):
    k1, k2 = jax.random.split(key)
    bound = 1.0 / math.sqrt(d_in)
    return {
        "W": jax.random.uniform(k1, (d_out, d_in), jnp.float32, -bound, bound),
        "b": jax.random.uniform(k2, (d_out,), jnp.float32, -bound, bound),
    }


def init_mha(key, d_model, head_num, k_dim):
    ks = jax.random.split(key, 6)
    hk = head_num * k_dim
    return {
        "q_linear": init_linear(ks[0], d_model, d_model),
        "k_linear": init_linear(ks[1], d_model, d_model),
        "v_linear": init_linear(ks[2], d_model, d_model),
        "q_multi_linear": init_linear(ks[3], d_model, hk),
        "k_multi_linear": init_linear(ks[4], d_model, hk),
        "v_multi_linear": init_linear(ks[5], d_model, d_model),
    }


def mha_reference(raw, x, y, mask, head_num, k_dim):
    """Direct transcription of the PyTorch forward (ground truth, f32 HIGHEST)."""
    hp = lax.Precision.HIGHEST

    def lin(p, t):
        return jnp.matmul(t, p["W"].T, precision=hp) + p["b"]

    q = lin(raw["q_multi_linear"], lin(raw["q_linear"], x))
    k = lin(raw["k_multi_linear"], lin(raw["k_linear"], y))
    v = lin(raw["v_multi_linear"], lin(raw["v_linear"], y))
    batch, sx, _ = q.shape
    sy = k.shape[1]
    q = q.reshape(batch, sx, head_num, -1).transpose(0, 2, 1, 3)
    k = k.reshape(batch, sy, head_num, -1).transpose(0, 2, 3, 1)
    v = v.reshape(batch, sy, head_num, -1).transpose(0, 2, 1, 3)
    s = jnp.matmul(q, k, precision=hp) / math.sqrt(k_dim)
    if mask is not None:
        s = jnp.where(mask, jnp.float32(1e-10), s)
    p = jax.nn.softmax(s, axis=3)
    o = jnp.matmul(p, v, precision=hp).transpose(0, 2, 1, 3)
    return o.reshape(batch, sx, -1)


# ---------------------------------------------------------------------------
# Demo
# ---------------------------------------------------------------------------

if __name__ == "__main__":
    D_MODEL, HEAD_NUM, K_DIM = 32, 2, 16
    B, SX, SY = 2, 8, 16                       # cross-attention shapes

    key = jax.random.PRNGKey(0)
    kp, kx, ky = jax.random.split(key, 3)

    raw = init_mha(kp, D_MODEL, HEAD_NUM, K_DIM)
    fused = fuse_mha_params(raw, K_DIM)        # one-time weight folding (+scale, bf16)

    x = jax.random.normal(kx, (B, SX, D_MODEL), jnp.float32)   # queries
    y = jax.random.normal(ky, (B, SY, D_MODEL), jnp.float32)   # keys / values

    # Padding-style key mask, broadcastable (right-aligned) to (B, H, Sx, Sy).
    valid_lens = jnp.array([SY - 4, SY - 2])
    mask = (jnp.arange(SY)[None, :] >= valid_lens[:, None])[:, None, None, :]  # (B,1,1,Sy) bool

    fwd = jax.jit(functools.partial(multi_head_attention,
                                    head_num=HEAD_NUM, k_dim=K_DIM))
    out = jax.block_until_ready(fwd(fused, x, y, mask))

    assert out.shape == (B, SX, D_MODEL), out.shape
    assert bool(jnp.all(jnp.isfinite(out)))

    ref = mha_reference(raw, x, y, mask, HEAD_NUM, K_DIM)
    # Loose tolerance: the kernel uses bf16 matmul operands (f32 accumulation),
    # folded weights and the approximate EUP reciprocal for the softmax norm.
    assert bool(jnp.allclose(out, ref, atol=5e-2, rtol=5e-2))

    print("KERNEL_OK")
</pallas_src>

<mosaic_0001>
module attributes {stable_mosaic.version = 11 : i64} {
  func.func @kernel(%arg0: i32, %arg1: i32, %arg2: memref<1x8x32xbf16, #tpu.memory_space<vmem>>, %arg3: memref<1x16x32xbf16, #tpu.memory_space<vmem>>, %arg4: memref<32x32xbf16, #tpu.memory_space<vmem>>, %arg5: memref<1x32xf32, #tpu.memory_space<vmem>>, %arg6: memref<32x64xbf16, #tpu.memory_space<vmem>>, %arg7: memref<1x64xf32, #tpu.memory_space<vmem>>, %arg8: memref<1x1x16xf32, #tpu.memory_space<vmem>>, %arg9: memref<1x8x32xf32, #tpu.memory_space<vmem>>) attributes {dimension_semantics = [#tpu.dimension_semantics<parallel>, #tpu.dimension_semantics<parallel>], iteration_bounds = array<i64: 2, 1>, scalar_prefetch = 0 : i64, scratch_operands = 0 : i64, tpu.core_type = #tpu.core_type<tc>, window_params = [{transform_indices = @transform_0, window_bounds = array<i64: 1, 8, 32>}, {transform_indices = @transform_1, window_bounds = array<i64: 1, 16, 32>}, {pipeline_mode = #tpu.pipeline_mode<synchronous>, transform_indices = @transform_2, window_bounds = array<i64: 32, 32>}, {pipeline_mode = #tpu.pipeline_mode<synchronous>, transform_indices = @transform_3, window_bounds = array<i64: 1, 32>}, {pipeline_mode = #tpu.pipeline_mode<synchronous>, transform_indices = @transform_4, window_bounds = array<i64: 32, 64>}, {pipeline_mode = #tpu.pipeline_mode<synchronous>, transform_indices = @transform_5, window_bounds = array<i64: 1, 64>}, {transform_indices = @transform_6, window_bounds = array<i64: 1, 1, 16>}, {transform_indices = @transform_7, window_bounds = array<i64: 1, 8, 32>}]} {
    %c0 = arith.constant 0 : index
    %c0_0 = arith.constant 0 : index
    %c0_1 = arith.constant 0 : index
    %0 = vector.load %arg2[%c0, %c0_0, %c0_1] : memref<1x8x32xbf16, #tpu.memory_space<vmem>>, vector<1x8x32xbf16>
    %1 = vector.shape_cast %0 : vector<1x8x32xbf16> to vector<8x32xbf16>
    %c0_2 = arith.constant 0 : index
    %c0_3 = arith.constant 0 : index
    %c0_4 = arith.constant 0 : index
    %2 = vector.load %arg3[%c0_2, %c0_3, %c0_4] : memref<1x16x32xbf16, #tpu.memory_space<vmem>>, vector<1x16x32xbf16>
    %3 = vector.shape_cast %2 : vector<1x16x32xbf16> to vector<16x32xbf16>
    %c0_5 = arith.constant 0 : index
    %c0_6 = arith.constant 0 : index
    %4 = vector.load %arg4[%c0_5, %c0_6] : memref<32x32xbf16, #tpu.memory_space<vmem>>, vector<32x32xbf16>
    %cst = arith.constant dense<0.000000e+00> : vector<8x32xf32>
    %5 = tpu.matmul %1, %4, %cst {dimension_numbers = #tpu.dot_dimension_numbers<[1], [0], [0], [1], [0, 0, 1, 1], [], []>} : vector<8x32xbf16>, vector<32x32xbf16>, vector<8x32xf32> -> vector<8x32xf32>
    %c0_7 = arith.constant 0 : index
    %c0_8 = arith.constant 0 : index
    %6 = vector.load %arg5[%c0_7, %c0_8] : memref<1x32xf32, #tpu.memory_space<vmem>>, vector<1x32xf32>
    %7 = vector.broadcast %6 : vector<1x32xf32> to vector<8x32xf32>
    %8 = arith.addf %5, %7 : vector<8x32xf32>
    %c0_9 = arith.constant 0 : index
    %c0_10 = arith.constant 0 : index
    %9 = vector.load %arg6[%c0_9, %c0_10] : memref<32x64xbf16, #tpu.memory_space<vmem>>, vector<32x64xbf16>
    %cst_11 = arith.constant dense<0.000000e+00> : vector<16x64xf32>
    %10 = tpu.matmul %3, %9, %cst_11 {dimension_numbers = #tpu.dot_dimension_numbers<[1], [0], [0], [1], [0, 0, 1, 1], [], []>} : vector<16x32xbf16>, vector<32x64xbf16>, vector<16x64xf32> -> vector<16x64xf32>
    %c0_12 = arith.constant 0 : index
    %c0_13 = arith.constant 0 : index
    %11 = vector.load %arg7[%c0_12, %c0_13] : memref<1x64xf32, #tpu.memory_space<vmem>>, vector<1x64xf32>
    %12 = vector.broadcast %11 : vector<1x64xf32> to vector<16x64xf32>
    %13 = arith.addf %10, %12 : vector<16x64xf32>
    %14 = vector.extract_strided_slice %13 {offsets = [0, 0], sizes = [16, 32], strides = [1, 1]} : vector<16x64xf32> to vector<16x32xf32>
    %15 = vector.extract_strided_slice %13 {offsets = [0, 32], sizes = [16, 32], strides = [1, 1]} : vector<16x64xf32> to vector<16x32xf32>
    %c0_14 = arith.constant 0 : index
    %c0_15 = arith.constant 0 : index
    %c0_16 = arith.constant 0 : index
    %16 = vector.load %arg8[%c0_14, %c0_15, %c0_16] : memref<1x1x16xf32, #tpu.memory_space<vmem>>, vector<1x1x16xf32>
    %17 = vector.shape_cast %16 : vector<1x1x16xf32> to vector<1x16xf32>
    %cst_17 = arith.constant 0.000000e+00 : f32
    %18 = vector.broadcast %cst_17 : f32 to vector<1x16xf32>
    %19 = arith.cmpf one, %17, %18 : vector<1x16xf32>
    %20 = vector.extract_strided_slice %8 {offsets = [0, 0], sizes = [8, 16], strides = [1, 1]} : vector<8x32xf32> to vector<8x16xf32>
    %21 = arith.truncf %20 : vector<8x16xf32> to vector<8x16xbf16>
    %22 = vector.extract_strided_slice %14 {offsets = [0, 0], sizes = [16, 16], strides = [1, 1]} : vector<16x32xf32> to vector<16x16xf32>
    %23 = arith.truncf %22 : vector<16x16xf32> to vector<16x16xbf16>
    %24 = vector.extract_strided_slice %15 {offsets = [0, 0], sizes = [16, 16], strides = [1, 1]} : vector<16x32xf32> to vector<16x16xf32>
    %25 = arith.truncf %24 : vector<16x16xf32> to vector<16x16xbf16>
    %cst_18 = arith.constant dense<0.000000e+00> : vector<8x16xf32>
    %26 = tpu.matmul %21, %23, %cst_18 {dimension_numbers = #tpu.dot_dimension_numbers<[1], [1], [0], [0], [0, 0, 1, 0], [], []>} : vector<8x16xbf16>, vector<16x16xbf16>, vector<8x16xf32> -> vector<8x16xf32>
    %cst_19 = arith.constant 1.000000e-10 : f32
    %27 = vector.shape_cast %19 : vector<1x16xi1> to vector<1x16xi1>
    %28 = vector.broadcast %27 : vector<1x16xi1> to vector<8x16xi1>
    %29 = vector.broadcast %cst_19 : f32 to vector<8x16xf32>
    %30 = arith.select %28, %29, %26 : vector<8x16xi1>, vector<8x16xf32>
    %cst_20 = arith.constant dense<0xFF800000> : vector<8xf32>
    %31 = vector.multi_reduction <maximumf>, %30, %cst_20 [1] : vector<8x16xf32> to vector<8xf32>
    %32 = vector.shape_cast %31 : vector<8xf32> to vector<8x1xf32>
    %33 = vector.broadcast %32 : vector<8x1xf32> to vector<8x16xf32>
    %34 = arith.subf %30, %33 : vector<8x16xf32>
    %35 = math.exp %34 : vector<8x16xf32>
    %cst_21 = arith.constant dense<0.000000e+00> : vector<8xf32>
    %36 = vector.multi_reduction <add>, %35, %cst_21 [1] : vector<8x16xf32> to vector<8xf32>
    %37 = vector.shape_cast %36 : vector<8xf32> to vector<8x1xf32>
    %38 = tpu.reciprocal %37 {approx = true} : vector<8x1xf32> -> vector<8x1xf32>
    %39 = vector.broadcast %38 : vector<8x1xf32> to vector<8x16xf32>
    %40 = arith.mulf %35, %39 : vector<8x16xf32>
    %41 = arith.truncf %40 : vector<8x16xf32> to vector<8x16xbf16>
    %cst_22 = arith.constant dense<0.000000e+00> : vector<8x16xf32>
    %42 = tpu.matmul %41, %25, %cst_22 {dimension_numbers = #tpu.dot_dimension_numbers<[1], [0], [0], [1], [0, 0, 1, 1], [], []>} : vector<8x16xbf16>, vector<16x16xbf16>, vector<8x16xf32> -> vector<8x16xf32>
    %c0_23 = arith.constant 0 : index
    %c0_24 = arith.constant 0 : index
    %c0_25 = arith.constant 0 : index
    %43 = vector.load %arg9[%c0_23, %c0_24, %c0_25] : memref<1x8x32xf32, #tpu.memory_space<vmem>>, vector<1x8x16xf32>
    %44 = vector.shape_cast %43 : vector<1x8x16xf32> to vector<8x16xf32>
    %45 = vector.shape_cast %42 : vector<8x16xf32> to vector<1x8x16xf32>
    tpu.vector_store %arg9[%c0_23, %c0_24, %c0_25], %45 {strides = array<i32>} : memref<1x8x32xf32, #tpu.memory_space<vmem>>, vector<1x8x16xf32>,
    %46 = vector.extract_strided_slice %8 {offsets = [0, 16], sizes = [8, 16], strides = [1, 1]} : vector<8x32xf32> to vector<8x16xf32>
    %47 = arith.truncf %46 : vector<8x16xf32> to vector<8x16xbf16>
    %48 = vector.extract_strided_slice %14 {offsets = [0, 16], sizes = [16, 16], strides = [1, 1]} : vector<16x32xf32> to vector<16x16xf32>
    %49 = arith.truncf %48 : vector<16x16xf32> to vector<16x16xbf16>
    %50 = vector.extract_strided_slice %15 {offsets = [0, 16], sizes = [16, 16], strides = [1, 1]} : vector<16x32xf32> to vector<16x16xf32>
    %51 = arith.truncf %50 : vector<16x16xf32> to vector<16x16xbf16>
    %cst_26 = arith.constant dense<0.000000e+00> : vector<8x16xf32>
    %52 = tpu.matmul %47, %49, %cst_26 {dimension_numbers = #tpu.dot_dimension_numbers<[1], [1], [0], [0], [0, 0, 1, 0], [], []>} : vector<8x16xbf16>, vector<16x16xbf16>, vector<8x16xf32> -> vector<8x16xf32>
    %cst_27 = arith.constant 1.000000e-10 : f32
    %53 = vector.shape_cast %19 : vector<1x16xi1> to vector<1x16xi1>
    %54 = vector.broadcast %53 : vector<1x16xi1> to vector<8x16xi1>
    %55 = vector.broadcast %cst_27 : f32 to vector<8x16xf32>
    %56 = arith.select %54, %55, %52 : vector<8x16xi1>, vector<8x16xf32>
    %cst_28 = arith.constant dense<0xFF800000> : vector<8xf32>
    %57 = vector.multi_reduction <maximumf>, %56, %cst_28 [1] : vector<8x16xf32> to vector<8xf32>
    %58 = vector.shape_cast %57 : vector<8xf32> to vector<8x1xf32>
    %59 = vector.broadcast %58 : vector<8x1xf32> to vector<8x16xf32>
    %60 = arith.subf %56, %59 : vector<8x16xf32>
    %61 = math.exp %60 : vector<8x16xf32>
    %cst_29 = arith.constant dense<0.000000e+00> : vector<8xf32>
    %62 = vector.multi_reduction <add>, %61, %cst_29 [1] : vector<8x16xf32> to vector<8xf32>
    %63 = vector.shape_cast %62 : vector<8xf32> to vector<8x1xf32>
    %64 = tpu.reciprocal %63 {approx = true} : vector<8x1xf32> -> vector<8x1xf32>
    %65 = vector.broadcast %64 : vector<8x1xf32> to vector<8x16xf32>
    %66 = arith.mulf %61, %65 : vector<8x16xf32>
    %67 = arith.truncf %66 : vector<8x16xf32> to vector<8x16xbf16>
    %cst_30 = arith.constant dense<0.000000e+00> : vector<8x16xf32>
    %68 = tpu.matmul %67, %51, %cst_30 {dimension_numbers = #tpu.dot_dimension_numbers<[1], [0], [0], [1], [0, 0, 1, 1], [], []>} : vector<8x16xbf16>, vector<16x16xbf16>, vector<8x16xf32> -> vector<8x16xf32>
    %c0_31 = arith.constant 0 : index
    %c0_32 = arith.constant 0 : index
    %c16 = arith.constant 16 : index
    %69 = vector.load %arg9[%c0_31, %c0_32, %c16] : memref<1x8x32xf32, #tpu.memory_space<vmem>>, vector<1x8x16xf32>
    %70 = vector.shape_cast %69 : vector<1x8x16xf32> to vector<8x16xf32>
    %71 = vector.shape_cast %68 : vector<8x16xf32> to vector<1x8x16xf32>
    tpu.vector_store %arg9[%c0_31, %c0_32, %c16], %71 {strides = array<i32>} : memref<1x8x32xf32, #tpu.memory_space<vmem>>, vector<1x8x16xf32>,
    return
  }
  func.func @transform_0(%arg0: i32, %arg1: i32) -> (i32, i32, i32) {
    %c0_i32 = arith.constant 0 : i32
    %c0_i32_0 = arith.constant 0 : i32
    return %arg0, %arg1, %c0_i32 : i32, i32, i32
  }
  func.func @transform_1(%arg0: i32, %arg1: i32) -> (i32, i32, i32) {
    %c0_i32 = arith.constant 0 : i32
    %c0_i32_0 = arith.constant 0 : i32
    %c0_i32_1 = arith.constant 0 : i32
    return %arg0, %c0_i32, %c0_i32_0 : i32, i32, i32
  }
  func.func @transform_2(%arg0: i32, %arg1: i32) -> (i32, i32) {
    %c0_i32 = arith.constant 0 : i32
    %c0_i32_0 = arith.constant 0 : i32
    %c0_i32_1 = arith.constant 0 : i32
    return %c0_i32, %c0_i32_0 : i32, i32
  }
  func.func @transform_3(%arg0: i32, %arg1: i32) -> (i32, i32) {
    %c0_i32 = arith.constant 0 : i32
    %c0_i32_0 = arith.constant 0 : i32
    %c0_i32_1 = arith.constant 0 : i32
    return %c0_i32, %c0_i32_0 : i32, i32
  }
  func.func @transform_4(%arg0: i32, %arg1: i32) -> (i32, i32) {
    %c0_i32 = arith.constant 0 : i32
    %c0_i32_0 = arith.constant 0 : i32
    %c0_i32_1 = arith.constant 0 : i32
    return %c0_i32, %c0_i32_0 : i32, i32
  }
  func.func @transform_5(%arg0: i32, %arg1: i32) -> (i32, i32) {
    %c0_i32 = arith.constant 0 : i32
    %c0_i32_0 = arith.constant 0 : i32
    %c0_i32_1 = arith.constant 0 : i32
    return %c0_i32, %c0_i32_0 : i32, i32
  }
  func.func @transform_6(%arg0: i32, %arg1: i32) -> (i32, i32, i32) {
    %c0_i32 = arith.constant 0 : i32
    %c0_i32_0 = arith.constant 0 : i32
    %c0_i32_1 = arith.constant 0 : i32
    return %arg0, %c0_i32, %c0_i32_0 : i32, i32, i32
  }
  func.func @transform_7(%arg0: i32, %arg1: i32) -> (i32, i32, i32) {
    %c0_i32 = arith.constant 0 : i32
    %c0_i32_0 = arith.constant 0 : i32
    return %arg0, %arg1, %c0_i32 : i32, i32, i32
  }
}

</mosaic_0001>

<bundles_post_ra>
// kernel: multi_head_attention.1
= control target key start
LH: loop header
LB: loop body
LE: loop exit
PB: predicated region body
PF: predicated region fallthrough
CT: control target
= control target key end

     0   :  { %12 = vsyncpa [#allocation3], 0  ;;  %s1273_s0 = inlined_call_operand.vmem [shape: bf16[2,8,32], index: 0, kind: input, shape index: {}]   ;;  %s1274_s1 = inlined_call_operand.vmem [shape: bf16[2,16,32], index: 1, kind: input, shape index: {}]   ;;  %s1275_s2 = inlined_call_operand.vmem [shape: bf16[32,32], index: 2, kind: input, shape index: {}]   ;;  %s1276_s3 = inlined_call_operand.vmem [shape: f32[1,32], index: 3, kind: input, shape index: {}]   ;;  %s1277_s4 = inlined_call_operand.vmem [shape: bf16[32,64], index: 4, kind: input, shape index: {}]   ;;  %s1278_s5 = inlined_call_operand.vmem [shape: f32[1,64], index: 5, kind: input, shape index: {}]   ;;  %s1279_s6 = inlined_call_operand.vmem [shape: f32[2,1,16], index: 6, kind: input, shape index: {}]   ;;  %s1280_s7 = inlined_call_operand.hbm [shape: f32[2,8,32], index: 7, kind: output, shape index: {}]  }
   0x1   :  { %14 = vsyncpa [#allocation3 + $0x1], 0  ;;  %s1101_s24 = smov 0   ;;  %s1103_s25 = smov 0  }
   0x2   :  { %s1105_s26 = smov 0   ;;  %s1107_s27 = smov 0  }
   0x3   :  { %s1109_s28 = smov 0   ;;  %s1111_s29 = smov 0  }
   0x4 LB: > { %s817_s30 = sadd.s32 4294967295, %s1051_s29   ;;  %s818_s8 = sadd.s32 4294967294, %s1051_s29   ;;  %s1051_s29 = sphi %s1111_s29, %s20_s29   ;;  %s1047_s28 = sphi %s1109_s28, %s1287_s28   ;;  %s1043_s27 = sphi %s1107_s27, %s1286_s27   ;;  %s1039_s26 = sphi %s1105_s26, %s1285_s26   ;;  %s1035_s25 = sphi %s1103_s25, %s1284_s25   ;;  %s1031_s24 = sphi %s1101_s24, %s1283_s24  }
   0x5   : > { %s32_s9 = sadd.s32 1, %s1047_s28  ;;  %s205_s10 = sadd.s32 1, %s1039_s26 }
   0x6   : > { %p34_p0 = scmp.ge.s32.totalorder %s32_s9, 2  ;;  %p215_p1 = scmp.ne.s32.totalorder %s1039_s26, %s1035_s25 }
   0x7   : > { %p216_p2 = scmp.eq.s32.totalorder %s817_s30, 1  ;;  %p221_p3 = scmp.ne.s32.totalorder %s1035_s25, %s1031_s24 }
   0x8   : > { %s1289_s9 = smov (%p34_p0, %s32_s9), 0  ;;  %p222_p5 = scmp.eq.s32.totalorder %s818_s8, 1 }
   0x9   : > { %p1141_p4 = por %p216_p2, %p215_p1  ;;  %s200_s12 = ssub.s32 %s1047_s28, %s1289_s9 }
   0xa   : > { %p821_p6 = scmp.ge.s32.totalorder %s1051_s29, 1  ;;  %p203_p7 = scmp.eq.s32.totalorder %s200_s12, 0 }
   0xb   : > { %p1148_p8 = por %p222_p5, %p221_p3  ;;  %p276_p9 = scmp.lt.s32.totalorder %s1051_s29, 3 }
   0xc   : > { %s1154_s14 = scalar_select %p203_p7, %s1039_s26, %s205_s10  }
   0xd   : > { %p277_p10 = pnand %p821_p6, %p276_p9 }
   0xe   : > { %v960_v0 = vld [vmem:[%s1277_s4] sm:$0xff] (!%p277_p10)   ;;  %v1053_v1 = vmov (!%p277_p10), 0.0   ;;  %v961_v2 = vld [vmem:[%s1277_s4 + $0x8] sm:$0xff] (!%p277_p10)   ;;  %vm1054_vm0 = vmmov (!%p277_p10), 0   ;;  %p318_p11 = scmp.lt.s32.totalorder (!%p277_p10), %s1043_s27, 1  ;;  %vm360_vm1 = vcmask (!%p277_p10), 261120   ;;  %v528_v26 = vlaneseq (!%p277_p10) }
   0xf   : > { %280 = sbr.rel (%p277_p10) target bundleno = 1238 (0x4d6), region = 48  ;;  %866 = vmatprep.subr.bf16.mxu1 (!%p277_p10), %v1053_v1  ;;  %858 = vmatprep.subr.bf16.mxu0 (!%p277_p10), %v1053_v1  ;;  %v963_v3 = vld [vmem:[%s1275_s2] sm:$0xff] (!%p277_p10)   ;;  %v964_v4 = vld [vmem:[%s1275_s2 + $0x8] sm:$0xff] (!%p277_p10)   ;;  %vm480_vm2 = vcmask (!%p277_p10), 130048   ;;  %v1056_v30 = vmov (!%p277_p10), 0   ;;  %s315_s16 = sand.u32 (!%p277_p10), 1, %s1035_s25  }
  0x10   : > { %867 = vmatpush3.bf16.msra.mxu1 (!%p277_p10), %v960_v0  ;;  %870 = vmatprep.mubr.msk.bf16.mxu1 (!%p277_p10), %vm1054_vm0, %v1053_v1  ;;  %v830_v7 = vld [vmem:[%s1278_s5] ss:$0 sm:$0xff] (!%p277_p10)  ;;  %v529_v28 = vshrl.u32 (!%p277_p10), %v528_v26, 7  ;;  %s822_s17 = sshll.u32 (!%p277_p10), %s315_s16, 3  ;;  %s1059_s19 = smov (!%p277_p10), 16   ;;  %vm708_vm5 = vcmask (!%p277_p10), 261248  }
  0x11   : > { %868 = vmatprep.subr.bf16.mxu1 (!%p277_p10), %v1053_v1  ;;  %862 = vmatprep.mubr.msk.bf16.mxu0 (!%p277_p10), %vm1054_vm0, %v1053_v1  ;;  %v826_v9 = vld [vmem:[%s1276_s3] ss:$0 sm:$0xff] (!%p277_p10)  ;;  %s840_s20 = sshll.u32 (!%p277_p10), %s1043_s27, 7  ;;  %s711_s10 = scalar_lea.sflag (!%p277_p10), [#allocation3], %s315_s16 }
  0x12   : > { %859 = vmatpush3.bf16.msra.mxu0 (!%p277_p10), %v963_v3  ;;  %v530_v29 = vsub.s32 (!%p277_p10), 0, %v529_v28 }
  0x13   : > { %860 = vmatprep.subr.bf16.mxu0 (!%p277_p10), %v1053_v1 }
  0x14   : > { %869 = vmatpush3.bf16.msra.mxu1 (!%p277_p10), %v961_v2 }
  0x15   : > { %880 = vmatprep.subr.bf16.mxu1 (!%p277_p10), %v1053_v1 }
  0x16   : > { %s1174_s21 = scalar_select %p318_p11, %s1043_s27, 1  ;;  %861 = vmatpush3.bf16.msra.mxu0 %v964_v4 }
  0x17   : > { %874 = vmatprep.subr.bf16.mxu0 %v1053_v1  ;;  %s1060_s27 = smov [#allocation2]  }
  0x18   : > { %s843_s30 = sshll.u32 %s1174_s21, 3  ;;  %s823_s8 = sshll.u32 %s1174_s21, 2 }
  0x19   : > { %s329_s15 = scalar_lea.vmem %s1274_s1, %s843_s30  ;;  %s324_s18 = scalar_lea.vmem %s1273_s0, %s823_s8 }
  0x1a   : > { %v962_v5 = vld [vmem:[%s329_s15] sm:$0xff]   ;;  %s1055_s30 = smov 112   ;;  %s332_s12 = scalar_lea.vmem %s1279_s6, %s1174_s21 }
  0x1b   : > { %v334_v6 = vld [vmem:[%s324_s18] sm:$0xf]  ;;  %871 = vmatmul.mubr.msk.bf16.vlgmr.msra.gmra.mrb[0].mxu1 %vm360_vm1, %v962_v5  ;;  %s1057_s21 = smov 96   ;;  %s1058_s15 = smov 80  }
  0x1c   : > { %882 = vmatprep.mubr.msk.bf16.mxu1 %vm1054_vm0, %v1053_v1  ;;  %863 = vmatmul.mubr.msk.bf16.vlgmr.msra.gmra.mrb[0].mxu0 %vm360_vm1, %v334_v6  ;;  %v476_v27 = vld [vmem:[%s332_s12] sm:$0x1]  ;;  %s317_s18 = scalar_lea.vmem [#allocation2], %s822_s17  ;;  %s1226_s8 = scalar_lea.hbm %s1280_s7, %s840_s20 }
  0x1d   : > { %876 = vmatprep.mubr.msk.bf16.mxu0 %vm1054_vm0, %v1053_v1  ;;  %vm477_vm3 = vcmp.ne.f32.partialorder %v476_v27, 0.0  ;;  %s725_s22 = sshll.u32 %s317_s18, 4  ;;  %s1228_s22 = int_to_ptr.vmem [resolvable:$true] %s725_s22 }
  0x1e   : > { %v527_v31 = vsel %vm477_vm3, 1, %v1056_v30  ;;  %s973_s12 = scalar_lea.vmem %s1228_s22, 128 }
  0x1f   : > { %v531_v32 = vrot.slane %v527_v31, %v530_v29  ;;  %p974_p12 = scmp.ne.s32.totalorder %s1228_s22, %s973_s12 }
  0x21   : > { %vm532_vm4 = vcmp.eq.s32.totalorder %v531_v32, 1  ;;  %p975_p13 = pnand %p974_p12, %p1141_p4 }
  0x23   : > { %p976_p0 = pneg %p975_p13 }
  0xee   : > { %v469_v8 = vpop.f32.mrb[0].mxu1 }
  0xef   : > { %v872_v10 = vpop.f32.mrb[1].mxu1  ;;  %v398_v12 = vpop.f32.mrb[0].mxu0  ;;  %v470_v13 = vadd.f32 %v830_v7, %v469_v8 }
  0xf0   : > { %v472_v11 = vpop.f32.mrb[2].mxu1  ;;  %v399_v16 = vadd.f32 %v826_v9, %v398_v12  ;;  %v864_v17 = vpop.f32.mrb[1].mxu0 }
  0xf1   : > { %v473_v14 = vadd.f32 %v830_v7, %v472_v11  ;;  %v873_v15 = vpop.f32.mrb[3].mxu1  ;;  %v401_v18 = vpop.f32.mrb[2].mxu0 }
  0xf2   : > { %v865_v20 = vpop.f32.mrb[3].mxu0  ;;  %v478_v21 = vpack.c.bf16 %v399_v16, %v399_v16 }
  0xf3   : > { %v479_v19 = vpack.c.bf16 %v473_v14, %v470_v13 }
  0xf5   : > { %597 = vrot.lane.b32.xlu0 %v479_v19, %s1055_s30  ;;  %v485_v22 = vsel %vm480_vm2, %v479_v19, 0 }
  0xf6   : > { %875 = vmatpush3.bf16.xpose.msra.mxu0 %v485_v22 }
  0xf7   : > { %886 = vmatprep.subr.bf16.mxu0 %v1053_v1 }
  0xf9   : > { %595 = vrot.lane.b32.xlu0 %v478_v21, %s1055_s30 }
  0xfd   : > { %877 = vmatmul.mubr.msk.bf16.vlgmr.msra.gmra.mrb[4].mxu0 %vm480_vm2, %v478_v21 }
  0xfe   : > { %888 = vmatprep.mubr.msk.bf16.mxu0 %vm1054_vm0, %v1053_v1 }
 0x167   : > { %v598_v23 = vpop.permute.xlu0 %597 }
 0x168   : > { %v603_v24 = vsel %vm480_vm2, %v598_v23, 0 }
 0x169   : > { %887 = vmatpush3.bf16.xpose.msra.mxu0 %v603_v24 }
 0x16b   : > { %v596_v25 = vpop.permute.xlu0 %595 }
 0x170   : > { %889 = vmatmul.mubr.msk.bf16.vlgmr.msra.gmra.mrb[8].mxu0 %vm480_vm2, %v596_v25 }
 0x1d0   : > { %v521_v33 = vpop.f32.mrb[4].mxu0 }
 0x1d1   : > { %v533_v34 = vsel %vm532_vm4, 1e-10, %v521_v33  ;;  %v878_v35 = vpop.f32.mrb[5].mxu0 }
 0x1d2   : > { %v524_v36 = vpop.f32.mrb[6].mxu0  ;;  %v534_v37 = vsel %vm480_vm2, %v533_v34, -inf }
 0x1d3   : > { %535 = vmax.xlane.f32.xlu1 %v534_v37  ;;  %v879_v38 = vpop.f32.mrb[7].mxu0 }
 0x243   : > { %v639_v39 = vpop.f32.mrb[8].mxu0 }
 0x244   : > { %v645_v40 = vsel %vm532_vm4, 1e-10, %v639_v39  ;;  %v890_v41 = vpop.f32.mrb[9].mxu0 }
 0x245   : > { %v642_v42 = vpop.f32.mrb[10].mxu0  ;;  %v646_v43 = vsel %vm480_vm2, %v645_v40, -inf }
 0x246   : > { %647 = vmax.xlane.f32.xlu1 %v646_v43  ;;  %v891_v44 = vpop.f32.mrb[11].mxu0 }
 0x257   : > { %547 = vrot.lane.b32.xlu1 %v479_v19, %s1057_s21  ;;  %s977_s21 = sshll.u32 %s1060_s27, 4  ;;  %s978_s21 = int_to_ptr.vmem [resolvable:$false] %s977_s21 }
 0x258   : > { %p980_p1 = scmp.lt.s32.totalorder %s1228_s22, %s978_s21 }
 0x260   : > { %v536_v45 = vpop.xlane.xlu1 %535 }
 0x261   : > { %v537_v46 = vsub.f32 %v533_v34, %v536_v45 }
 0x263   : > { %v538_v47 = vmul.f32 1.442695, %v537_v46 }
 0x265   : > { %965 = vpow2.f32 %v538_v47 }
 0x26f   : > { %v966_v48 = vpop.eup %965 }
 0x270   : > { %v540_v49 = vsel %vm480_vm2, %v966_v48, 0.0 }
 0x271   : > { %541 = vadd.xlane.f32.xlu0 %v540_v49 }
 0x2d3   : > { %v648_v50 = vpop.xlane.xlu1 %647 }
 0x2d4   : > { %v649_v51 = vsub.f32 %v645_v40, %v648_v50 }
 0x2d6   : > { %v650_v52 = vmul.f32 1.442695, %v649_v51 }
 0x2d7   : > { %v548_v53 = vpop.permute.xlu1 %547 }
 0x2d8   : > { %967 = vpow2.f32 %v650_v52  ;;  %881 = vmatpush3.bf16.msra.mxu1 %v548_v53 }
 0x2d9   : > { %892 = vmatprep.subr.bf16.mxu1 %v1053_v1 }
 0x2e2   : > { %v968_v54 = vpop.eup %967 }
 0x2e3   : > { %v652_v55 = vsel %vm480_vm2, %v968_v54, 0.0 }
 0x2e4   : > { %653 = vadd.xlane.f32.xlu1 %v652_v55 }
 0x2f5   : > { %658 = vrot.lane.b32.xlu1 %v479_v19, %s1058_s15  ;;  %s979_s15 = scalar_lea.vmem %s978_s21, 256 }
 0x2f6   : > { %p981_p2 = scmp.lt.s32.totalorder %s979_s15, %s973_s12 }
 0x2f8   : > { %p982_p3 = por %p981_p2, %p980_p1 }
 0x2fa   : > { %p983_p5 = pnand %p982_p3, %p976_p0 }
 0x2fe   : > { %v542_v56 = vpop.xlane.xlu0 %541 }
 0x2ff   : > { %969 = vrcp.f32 %v542_v56 }
 0x309   : > { %v970_v57 = vpop.eup %969 }
 0x30a   : > { %v544_v58 = vmul.f32 %v970_v57, %v966_v48 }
 0x30c   : > { %v545_v59 = vpack.c.bf16 %v544_v58, %v544_v58 }
 0x30e   : > { %883 = vmatmul.mubr.msk.bf16.vlgmr.msra.gmra.mrb[4].mxu1 %vm480_vm2, %v545_v59 }
 0x30f   : > { %894 = vmatprep.mubr.msk.bf16.mxu1 %vm1054_vm0, %v1053_v1 }
 0x371   : > { %v654_v60 = vpop.xlane.xlu1 %653 }
 0x372   : > { %971 = vrcp.f32 %v654_v60 }
 0x375   : > { %v659_v61 = vpop.permute.xlu1 %658 }
 0x376   : > { %893 = vmatpush3.bf16.msra.mxu1 %v659_v61 }
 0x37c   : > { %v972_v62 = vpop.eup %971 }
 0x37d   : > { %v656_v63 = vmul.f32 %v972_v62, %v968_v54 }
 0x37f   : > { %v657_v0 = vpack.c.bf16 %v656_v63, %v656_v63 }
 0x381   : > { %895 = vmatmul.mubr.msk.bf16.vlgmr.msra.gmra.mrb[8].mxu1 %vm480_vm2, %v657_v0 }
 0x3e1   : > { %v587_v2 = vpop.f32.mrb[4].mxu1 }
 0x3e2   : > { %593 = vst.msk [vmem:[%s317_s18] sm:$0xff] %vm480_vm2, %v587_v2  ;;  %v884_v3 = vpop.f32.mrb[5].mxu1 }
 0x3e3   : > { %v590_v4 = vpop.f32.mrb[6].mxu1 }
 0x3e4   : > { %v885_v5 = vpop.f32.mrb[7].mxu1 }
 0x454   : > { %v698_v1 = vpop.f32.mrb[8].mxu1 }
 0x455   : > { %705 = vrot.lane.b32.xlu1 %v698_v1, %s1059_s19  ;;  %v896_v6 = vpop.f32.mrb[9].mxu1 }
 0x456   : > { %v701_v7 = vpop.f32.mrb[10].mxu1 }
 0x457   : > { %v897_v8 = vpop.f32.mrb[11].mxu1 }
 0x4c7   : > { %v706_v9 = vpop.permute.xlu1 %705 }
 0x4c8   : > { %709 = vst.msk [vmem:[%s317_s18] sm:$0xff] %vm708_vm5, %v706_v9 }
 0x4c9   : > { %986 = shalt.err (!%p983_p5)
}
 0x4ca   : > { %s987_s16 = scalar_lea.hbm %s1226_s8, 128  ;;  %s991_s19 = scalar_lea.hbm %s1280_s7, 256 }
 0x4cb   : > { %p988_p6 = scmp.ne.s32.totalorder %s1226_s8, %s987_s16  ;;  %p992_p10 = scmp.lt.u32.totalorder %s1226_s8, %s1280_s7 }
 0x4cc   : > { %p993_p11 = scmp.lt.u32.totalorder %s991_s19, %s987_s16  ;;  %p995_p13 = scmp.lt.u32.totalorder %s987_s16, %s1226_s8 }
 0x4cd   : > { %p989_p7 = pnand %p988_p6, %p1141_p4 }
 0x4ce   : > { %p994_p12 = por %p993_p11, %p992_p10 }
 0x4cf   : > { %p990_p9 = pneg %p989_p7 }
 0x4d0   : > { %p996_p0 = por %p995_p13, %p994_p12 }
 0x4d2   : > { %p997_p1 = pnand %p996_p0, %p990_p9 }
 0x4d4   : > { %1000 = shalt.err (!%p997_p1)
}
 0x4d5   : > { %898 = dma.vmem_to_hbm [thread:$0]  (%p1141_p4), %s1228_s22, 128, %s1226_s8, %s711_s10  }
 0x4d6 PF: > { %p904_p2 = scmp.ge.s32.totalorder %s1051_s29, 2  ;;  %s737_s30 = sand.u32 1, %s1031_s24  }
 0x4d7   : > { %s738_s12 = scalar_lea.sflag [#allocation3], %s737_s30 }
 0x4d8   : > { %p901_p3 = pnand %p904_p2, %p1148_p8 }
 0x4da   : > { %1026 = dma.done.wait (!%p901_p3), %s738_s12, 128  }
 0x4db   : > { %1028 = vsyncadd (!%p901_p3), %s738_s12, 4294967168  ;;  %s20_s29 = sadd.s32 1, %s1051_s29   ;;  %s1283_s24 = smov %s1035_s25 }
 0x4dc   : > { %p17_p5 = scmp.ge.s32.totalorder %s20_s29, 4   ;;  %s1284_s25 = smov %s1039_s26 }
 0x4dd   : > { %s1285_s26 = smov %s1154_s14  ;;  %s1286_s27 = smov %s1047_s28 }
 0x4de   : > { %s1287_s28 = smov %s1289_s9  ;;  %19 = sbr.rel (!%p17_p5) target bundleno = 4 (0x4), region = 89 }
 0x4e5   :  { %743 = vsyncpa [#allocation3], 1 }
 0x4e6   :  { %745 = vsyncpa [#allocation3 + $0x1], 1 }

</bundles_post_ra>
